<compile_context>
chip_gen: v7x
topology: tpu7x:2x2x1
jax: 0.10.0
libtpu: 0.0.40
codegen_flags: <defaults>
</compile_context>

<pallas_src>
import functools

import jax
import jax.numpy as jnp
from jax.experimental import pallas as pl
from jax.experimental.pallas import tpu as pltpu

_LANE = 128
_SUBLANE = 8
_MAX_BLOCK_SAMPLES = 32 * 1024  # 32768 samples/block: ~0.78 MB of VMEM per block


def _round_up(x, m):
    return (x + m - 1) // m * m


def _accuracy_kernel(pred_ref, tgt_ref, out_ref, *, thresh):
    """One grid step: count top-1 matches over a lane-dense block of samples.

    pred_ref: (5, R, 128) f32   class-major prediction slab
    tgt_ref : (R, 128)   int32  raw targets (-1 marks padded samples)
    out_ref : (8, 128)   f32    per-block partial counts (summed in the wrapper)
    """
    # pred remap (the `domain=False` branch of accuracy()):
    #   class0 = p[:,0] + p[:,2]; class1 = p[:,1] + p[:,3]; class2 = p[:,4]
    c0 = pred_ref[0] + pred_ref[2]          # (R, 128)
    c1 = pred_ref[1] + pred_ref[3]
    c2 = pred_ref[4]

    # top-1 label with first-occurrence tie breaking (matches argmax/topk order)
    is0 = (c0 >= c1) & (c0 >= c2)
    is1 = jnp.logical_not(is0) & (c1 >= c2)
    label = jnp.where(is0, 0, jnp.where(is1, 1, 2)).astype(jnp.int32)

    # target remap: target = 2 if target_ == 4 else target_ % 2
    t = tgt_ref[...]                        # (R, 128) int32
    tgt = jnp.where(t == 4, 2, jnp.mod(t, 2)).astype(jnp.int32)

    correct = (label == tgt) & (t >= 0)     # t < 0 marks padded samples
    if thresh is not None:
        max_v = jnp.maximum(jnp.maximum(c0, c1), c2)
        correct = correct & (max_v > thresh)

    # fold the R/8 sub-slabs into one (8, 128) vreg with pure VPU adds;
    # the single cross-lane reduce happens once, in the JAX wrapper.
    cf = correct.astype(jnp.float32)        # (R, 128)
    out_ref[...] = jnp.sum(cf.reshape(-1, _SUBLANE, _LANE), axis=0)


def accuracy_tpu(pred, target, topk=(1,), thresh=None):
    """JAX/Pallas equivalent of accuracy(pred, target, domain=False, topk, thresh)."""
    if isinstance(topk, int):
        topk = (topk,)
        return_single = True
    else:
        return_single = False
    assert all(k == 1 for k in topk), "only top-1 is implemented in-kernel"
    # TODO(synk): general top-k (k > 1) over the 3 remapped classes not implemented.

    n, c = pred.shape
    assert c >= 5, "accuracy() non-domain branch requires >= 5 prediction columns"
    if n == 0:
        res = [jnp.zeros((1,), jnp.float32) for _ in topk]
        return res[0] if return_single else tuple(res)

    # -- choose block size: >= 1024 samples per grid step, capped at 32768 --
    block_samples = min(_MAX_BLOCK_SAMPLES, _round_up(n, _SUBLANE * _LANE))
    n_pad = _round_up(n, block_samples)
    rows = n_pad // _LANE
    rows_per_block = block_samples // _LANE     # multiple of 8
    num_blocks = rows // rows_per_block

    # -- lane-dense slabs: transpose + pad fused into one XLA pass each --
    pred5 = pred[:, :5].astype(jnp.float32)
    pred_slab = (
        jnp.zeros((5, n_pad), jnp.float32)
        .at[:, :n].set(pred5.T)
        .reshape(5, rows, _LANE)
    )
    tgt_slab = (
        jnp.full((n_pad,), -1, jnp.int32)      # -1 => padded sample, masked in-kernel
        .at[:n].set(target.astype(jnp.int32))
        .reshape(rows, _LANE)
    )

    kernel = functools.partial(_accuracy_kernel, thresh=thresh)
    partials = pl.pallas_call(
        kernel,
        out_shape=jax.ShapeDtypeStruct((num_blocks * _SUBLANE, _LANE), jnp.float32),
        grid_spec=pltpu.PrefetchScalarGridSpec(
            num_scalar_prefetch=0,
            grid=(num_blocks,),
            in_specs=[
                pl.BlockSpec((5, rows_per_block, _LANE), lambda i: (0, i, 0)),
                pl.BlockSpec((rows_per_block, _LANE), lambda i: (i, 0)),
            ],
            out_specs=pl.BlockSpec((_SUBLANE, _LANE), lambda i: (i, 0)),
        ),
        compiler_params=pltpu.CompilerParams(dimension_semantics=("parallel",)),
    )(pred_slab, tgt_slab)

    # final reduce + scale in the wrapper (kernel stays a pure, shape-stable count)
    acc = (jnp.sum(partials) * (100.0 / n)).reshape((1,)).astype(jnp.float32)
    res = [acc for _ in topk]
    return res[0] if return_single else tuple(res)


class AccuracyPallas:
    """Mirror of the PyTorch Accuracy module (no learnable parameters)."""

    def __init__(self, topk=(1,), thresh=None):
        self.topk = topk
        self.thresh = thresh

    def __call__(self, pred, target):
        # NOTE: the original forward passes self.topk into the `domain` positional
        # slot (a bug that would crash in PyTorch); we implement the intended
        # semantics: domain=False, topk=self.topk, thresh=self.thresh.
        # TODO(synk): the domain=True branch (host-side np.argwhere filtering)
        # has no clean Pallas equivalent and is not implemented.
        return accuracy_tpu(pred, target, topk=self.topk, thresh=self.thresh)


def _accuracy_ref(pred, target, thresh=None):
    """Pure-JAX reference of the non-domain branch, top-1."""
    c0 = pred[:, 0] + pred[:, 2]
    c1 = pred[:, 1] + pred[:, 3]
    c2 = pred[:, 4]
    scores = jnp.stack([c0, c1, c2], axis=1)
    label = jnp.argmax(scores, axis=1)
    tgt = jnp.where(target == 4, 2, target % 2)
    correct = label == tgt
    if thresh is not None:
        correct = correct & (scores.max(axis=1) > thresh)
    return correct.astype(jnp.float32).sum() * 100.0 / pred.shape[0]


if __name__ == "__main__":
    key = jax.random.PRNGKey(0)
    k1, k2, k3, k4 = jax.random.split(key, 4)

    # small shapes consistent with the module: (N, num_class=5) preds, labels in {0..4}
    N, C = 16, 5
    pred = jax.random.normal(k1, (N, C), dtype=jnp.float32)
    target = jax.random.randint(k2, (N,), 0, 5, dtype=jnp.int32)

    module = AccuracyPallas(topk=(1,), thresh=None)
    (acc,) = module(pred, target)
    acc = jax.block_until_ready(acc)
    ref = _accuracy_ref(pred, target)
    assert jnp.allclose(acc[0], ref, atol=1e-4), (acc, ref)

    # second check: batch not a multiple of 128/1024 (exercises padding) + threshold
    N2 = 300
    pred2 = jax.random.normal(k3, (N2, C), dtype=jnp.float32)
    target2 = jax.random.randint(k4, (N2,), 0, 5, dtype=jnp.int32)
    module2 = AccuracyPallas(topk=(1,), thresh=0.2)
    (acc2,) = module2(pred2, target2)
    acc2 = jax.block_until_ready(acc2)
    ref2 = _accuracy_ref(pred2, target2, thresh=0.2)
    assert jnp.allclose(acc2[0], ref2, atol=1e-4), (acc2, ref2)

    print("KERNEL_OK")
</pallas_src>

<mosaic_0001>
module attributes {stable_mosaic.version = 11 : i64} {
  func.func @_accuracy_kernel(%arg0: i32, %arg1: memref<5x8x128xf32, #tpu.memory_space<vmem>>, %arg2: memref<8x128xi32, #tpu.memory_space<vmem>>, %arg3: memref<8x128xf32, #tpu.memory_space<vmem>>) attributes {dimension_semantics = [#tpu.dimension_semantics<parallel>], iteration_bounds = array<i64: 1>, scalar_prefetch = 0 : i64, scratch_operands = 0 : i64, tpu.core_type = #tpu.core_type<tc>, window_params = [{transform_indices = @transform_0, window_bounds = array<i64: 5, 8, 128>}, {transform_indices = @transform_1, window_bounds = array<i64: 8, 128>}, {transform_indices = @transform_2, window_bounds = array<i64: 8, 128>}]} {
    %c0 = arith.constant 0 : index
    %c0_0 = arith.constant 0 : index
    %c0_1 = arith.constant 0 : index
    %0 = vector.load %arg1[%c0, %c0_0, %c0_1] : memref<5x8x128xf32, #tpu.memory_space<vmem>>, vector<1x8x128xf32>
    %1 = vector.shape_cast %0 : vector<1x8x128xf32> to vector<8x128xf32>
    %c2 = arith.constant 2 : index
    %c0_2 = arith.constant 0 : index
    %c0_3 = arith.constant 0 : index
    %2 = vector.load %arg1[%c2, %c0_2, %c0_3] : memref<5x8x128xf32, #tpu.memory_space<vmem>>, vector<1x8x128xf32>
    %3 = vector.shape_cast %2 : vector<1x8x128xf32> to vector<8x128xf32>
    %4 = arith.addf %1, %3 : vector<8x128xf32>
    %c1 = arith.constant 1 : index
    %c0_4 = arith.constant 0 : index
    %c0_5 = arith.constant 0 : index
    %5 = vector.load %arg1[%c1, %c0_4, %c0_5] : memref<5x8x128xf32, #tpu.memory_space<vmem>>, vector<1x8x128xf32>
    %6 = vector.shape_cast %5 : vector<1x8x128xf32> to vector<8x128xf32>
    %c3 = arith.constant 3 : index
    %c0_6 = arith.constant 0 : index
    %c0_7 = arith.constant 0 : index
    %7 = vector.load %arg1[%c3, %c0_6, %c0_7] : memref<5x8x128xf32, #tpu.memory_space<vmem>>, vector<1x8x128xf32>
    %8 = vector.shape_cast %7 : vector<1x8x128xf32> to vector<8x128xf32>
    %9 = arith.addf %6, %8 : vector<8x128xf32>
    %c4 = arith.constant 4 : index
    %c0_8 = arith.constant 0 : index
    %c0_9 = arith.constant 0 : index
    %10 = vector.load %arg1[%c4, %c0_8, %c0_9] : memref<5x8x128xf32, #tpu.memory_space<vmem>>, vector<1x8x128xf32>
    %11 = vector.shape_cast %10 : vector<1x8x128xf32> to vector<8x128xf32>
    %12 = arith.cmpf oge, %4, %9 : vector<8x128xf32>
    %13 = arith.cmpf oge, %4, %11 : vector<8x128xf32>
    %14 = arith.andi %12, %13 : vector<8x128xi1>
    %cst = arith.constant dense<true> : vector<8x128xi1>
    %15 = arith.xori %14, %cst : vector<8x128xi1>
    %16 = arith.cmpf oge, %9, %11 : vector<8x128xf32>
    %17 = arith.andi %15, %16 : vector<8x128xi1>
    %c1_i32 = arith.constant 1 : i32
    %c2_i32 = arith.constant 2 : i32
    %18 = vector.broadcast %c1_i32 : i32 to vector<8x128xi32>
    %19 = vector.broadcast %c2_i32 : i32 to vector<8x128xi32>
    %20 = arith.select %17, %18, %19 : vector<8x128xi1>, vector<8x128xi32>
    %c0_i32 = arith.constant 0 : i32
    %21 = vector.broadcast %c0_i32 : i32 to vector<8x128xi32>
    %22 = arith.select %14, %21, %20 : vector<8x128xi1>, vector<8x128xi32>
    %c0_10 = arith.constant 0 : index
    %c0_11 = arith.constant 0 : index
    %23 = vector.load %arg2[%c0_10, %c0_11] : memref<8x128xi32, #tpu.memory_space<vmem>>, vector<8x128xi32>
    %c4_i32 = arith.constant 4 : i32
    %24 = vector.broadcast %c4_i32 : i32 to vector<8x128xi32>
    %25 = arith.cmpi eq, %23, %24 : vector<8x128xi32>
    %c2_i32_12 = arith.constant 2 : i32
    %c0_i32_13 = arith.constant 0 : i32
    %26 = arith.cmpi eq, %c2_i32_12, %c0_i32_13 : i32
    %c1_i32_14 = arith.constant 1 : i32
    %27 = arith.select %26, %c1_i32_14, %c2_i32_12 : i32
    %28 = vector.broadcast %27 : i32 to vector<8x128xi32>
    %29 = arith.remsi %23, %28 : vector<8x128xi32>
    %c0_i32_15 = arith.constant 0 : i32
    %30 = vector.broadcast %c0_i32_15 : i32 to vector<8x128xi32>
    %31 = arith.cmpi ne, %29, %30 : vector<8x128xi32>
    %c0_i32_16 = arith.constant 0 : i32
    %32 = vector.broadcast %c0_i32_16 : i32 to vector<8x128xi32>
    %33 = arith.cmpi slt, %29, %32 : vector<8x128xi32>
    %c0_i32_17 = arith.constant 0 : i32
    %34 = arith.cmpi slt, %27, %c0_i32_17 : i32
    %35 = vector.broadcast %34 : i1 to vector<8x128xi1>
    %36 = vector.broadcast %35 : vector<8x128xi1> to vector<8x128xi1>
    %37 = arith.xori %33, %36 : vector<8x128xi1>
    %38 = arith.andi %37, %31 : vector<8x128xi1>
    %39 = vector.broadcast %27 : i32 to vector<8x128xi32>
    %40 = arith.addi %29, %39 : vector<8x128xi32>
    %41 = arith.select %38, %40, %29 : vector<8x128xi1>, vector<8x128xi32>
    %c2_i32_18 = arith.constant 2 : i32
    %42 = vector.broadcast %c2_i32_18 : i32 to vector<8x128xi32>
    %43 = arith.select %25, %42, %41 : vector<8x128xi1>, vector<8x128xi32>
    %44 = arith.cmpi eq, %22, %43 : vector<8x128xi32>
    %c0_i32_19 = arith.constant 0 : i32
    %45 = vector.broadcast %c0_i32_19 : i32 to vector<8x128xi32>
    %46 = arith.cmpi sge, %23, %45 : vector<8x128xi32>
    %47 = arith.andi %44, %46 : vector<8x128xi1>
    %48 = arith.extui %47 : vector<8x128xi1> to vector<8x128xi32>
    %49 = arith.sitofp %48 : vector<8x128xi32> to vector<8x128xf32>
    %50 = vector.shape_cast %49 : vector<8x128xf32> to vector<1x8x128xf32>
    %cst_20 = arith.constant dense<0.000000e+00> : vector<8x128xf32>
    %51 = vector.multi_reduction <add>, %50, %cst_20 [0] : vector<1x8x128xf32> to vector<8x128xf32>
    %c0_21 = arith.constant 0 : index
    %c0_22 = arith.constant 0 : index
    %52 = vector.load %arg3[%c0_21, %c0_22] : memref<8x128xf32, #tpu.memory_space<vmem>>, vector<8x128xf32>
    tpu.vector_store %arg3[%c0_21, %c0_22], %51 {strides = array<i32>} : memref<8x128xf32, #tpu.memory_space<vmem>>, vector<8x128xf32>,
    return
  }
  func.func @transform_0(%arg0: i32) -> (i32, i32, i32) {
    %c0_i32 = arith.constant 0 : i32
    %c0_i32_0 = arith.constant 0 : i32
    %c0_i32_1 = arith.constant 0 : i32
    return %c0_i32, %arg0, %c0_i32_0 : i32, i32, i32
  }
  func.func @transform_1(%arg0: i32) -> (i32, i32) {
    %c0_i32 = arith.constant 0 : i32
    %c0_i32_0 = arith.constant 0 : i32
    return %arg0, %c0_i32 : i32, i32
  }
  func.func @transform_2(%arg0: i32) -> (i32, i32) {
    %c0_i32 = arith.constant 0 : i32
    %c0_i32_0 = arith.constant 0 : i32
    return %arg0, %c0_i32 : i32, i32
  }
}

</mosaic_0001>

<bundles_post_ra>
// kernel: tpu_custom_call.1
= control target key start
LH: loop header
LB: loop body
LE: loop exit
PB: predicated region body
PF: predicated region fallthrough
CT: control target
= control target key end

     0   :  { %7 = vsyncpa [#allocation3], 0  ;;  %s244_s0 = inlined_call_operand.hbm [shape: f32[5,8,128], index: 0, kind: input, shape index: {}]   ;;  %s245_s1 = inlined_call_operand.hbm [shape: s32[8,128], index: 1, kind: input, shape index: {}]   ;;  %s246_s2 = inlined_call_operand.hbm [shape: f32[8,128], index: 2, kind: output, shape index: {}]  }
   0x1   :  { %8 = vsyncpa [#allocation6], 0 }
   0x2   :  { %9 = vsyncpa [#allocation4], 0  ;;  %s177_s9 = smov [#allocation2]   ;;  %s105_s13 = scalar_lea.hbm %s244_s0, 640 }
   0x3   :  { %s15_s10 = sshll.u32 %s177_s9, 4  ;;  %p106_p0 = scmp.ne.s32.totalorder %s244_s0, %s105_s13  ;;  %s16_s10 = int_to_ptr.vmem [resolvable:$true] %s15_s10 }
   0x4   :  { %p109_p1 = scmp.lt.u32.totalorder %s105_s13, %s244_s0 }
   0x6   :  { %p111_p2 = pnand %p109_p1, %p106_p0 }
   0x8   :  { %114 = shalt.err (!%p111_p2)
}
   0x9   :  { %s115_s18 = scalar_lea.vmem %s16_s10, 640  ;;  %p120_p4 = scmp.lt.s32.totalorder %s16_s10, %s16_s10 }
   0xa   :  { %p116_p3 = scmp.ne.s32.totalorder %s16_s10, %s115_s18  ;;  %p121_p5 = scmp.lt.s32.totalorder %s115_s18, %s115_s18 }
   0xc   :  { %p122_p6 = por %p121_p5, %p120_p4 }
   0xe   :  { %p123_p7 = pnand %p122_p6, %p116_p3 }
  0x10   :  { %126 = shalt.err (!%p123_p7)
}
  0x11   :  { %s178_s19 = smov 128   ;;  %s179_s20 = smov 8  }
  0x12   :  { %21 = dma.hbm_to_vmem [thread:$0]  %s244_s0, 640, %s16_s10, [#allocation3], %s178_s19, %s178_s19, %s179_s20  }
  0x13   :  { %s180_s23 = smov [#allocation5]   ;;  %s127_s27 = scalar_lea.hbm %s245_s1, 128 }
  0x14   :  { %s28_s24 = sshll.u32 %s180_s23, 4  ;;  %p128_p8 = scmp.ne.s32.totalorder %s245_s1, %s127_s27  ;;  %s29_s24 = int_to_ptr.vmem [resolvable:$true] %s28_s24 }
  0x15   :  { %p131_p9 = scmp.lt.u32.totalorder %s127_s27, %s245_s1 }
  0x17   :  { %p133_p10 = pnand %p131_p9, %p128_p8 }
  0x19   :  { %136 = shalt.err (!%p133_p10)
}
  0x1a   :  { %s137_s4 = scalar_lea.vmem %s29_s24, 128  ;;  %p142_p12 = scmp.lt.s32.totalorder %s29_s24, %s29_s24 }
  0x1b   :  { %p138_p11 = scmp.ne.s32.totalorder %s29_s24, %s137_s4  ;;  %p143_p13 = scmp.lt.s32.totalorder %s137_s4, %s137_s4 }
  0x1d   :  { %p144_p0 = por %p143_p13, %p142_p12 }
  0x1f   :  { %p145_p1 = pnand %p144_p0, %p138_p11 }
  0x21   :  { %148 = shalt.err (!%p145_p1)
}
  0x22   :  { %31 = dma.hbm_to_vmem [thread:$0]  %s245_s1, 128, %s29_s24, [#allocation6]  }
  0x23   :  { %171 = dma.done.wait [#allocation3], 640  }
  0x24   :  { %172 = vsyncadd [#allocation3], 4294966656 }
  0x25   :  { %173 = dma.done.wait [#allocation6], 128  }
  0x26   :  { %174 = vsyncadd [#allocation6], 4294967168  ;;  %v38_v0 = vld [vmem:[#allocation2] sm:$0xff]  ;;  %v40_v1 = vld [vmem:[#allocation2 + $0x10] sm:$0xff]  ;;  %vm181_vm4 = vmmov 1   ;;  %v182_v13 = vmov 2  }
  0x27   :  { %v43_v2 = vld [vmem:[#allocation2 + $0x8] sm:$0xff]  ;;  %v41_v3 = vadd.f32 %v40_v1, %v38_v0  ;;  %v45_v4 = vld [vmem:[#allocation2 + $0x18] sm:$0xff]  ;;  %v48_v5 = vld [vmem:[#allocation2 + $0x20] sm:$0xff]  ;;  %s183_s1 = smov [#allocation7]   ;;  %v184_v20 = vmov 0.0  }
  0x28   :  { %v57_v6 = vld [vmem:[#allocation5] sm:$0xff]  ;;  %v46_v7 = vadd.f32 %v45_v4, %v43_v2  ;;  %s85_s6 = sshll.u32 %s183_s1, 4  ;;  %s86_s6 = int_to_ptr.vmem [resolvable:$true] %s85_s6 }
  0x29   :  { %v60_v8 = vsub.s32 0, %v57_v6  ;;  %vm50_vm0 = vcmp.ge.f32.partialorder %v41_v3, %v48_v5  ;;  %vm59_vm7 = vcmp.lt.s32.totalorder %v57_v6, 0  ;;  %vm58_vm8 = vcmp.eq.s32.totalorder %v57_v6, 4  ;;  %s149_s7 = scalar_lea.vmem %s86_s6, 128  ;;  %p154_p3 = scmp.lt.s32.totalorder %s86_s6, %s86_s6 }
  0x2a   :  { %vm49_vm1 = vcmp.ge.f32.partialorder %v41_v3, %v46_v7  ;;  %vm53_vm2 = vcmp.ge.f32.partialorder %v46_v7, %v48_v5  ;;  %vm73_vm12 = vcmp.ge.s32.totalorder %v57_v6, 0  ;;  %p150_p2 = scmp.ne.s32.totalorder %s86_s6, %s149_s7  ;;  %p155_p4 = scmp.lt.s32.totalorder %s149_s7, %s149_s7 }
  0x2b   :  { %v95_v9 = vmin.u32 %v60_v8, %v57_v6  ;;  %vm224_vm3 = vmand %vm49_vm1, %vm50_vm0 }
  0x2c   :  { %vm52_vm5 = vmxor %vm224_vm3, %vm181_vm4  ;;  %p156_p5 = por %p155_p4, %p154_p3 }
  0x2d   :  { %v63_v11 = vand.u32 1, %v95_v9  ;;  %vm54_vm6 = vmand %vm52_vm5, %vm53_vm2 }
  0x2e   :  { %v55_v14 = vsel %vm54_vm6, 1, %v182_v13  ;;  %p157_p6 = pnand %p156_p5, %p150_p2 }
  0x2f   :  { %v64_v12 = vsub.s32 0, %v63_v11  ;;  %v56_v17 = vsel %vm224_vm3, 0, %v55_v14 }
  0x31   :  { %v65_v15 = vsel %vm59_vm7, %v64_v12, %v63_v11 }
  0x32   :  { %vm66_vm9 = vcmp.ne.s32.totalorder %v65_v15, 0  ;;  %vm67_vm10 = vcmp.lt.s32.totalorder %v65_v15, 0  ;;  %v69_v16 = vadd.s32 2, %v65_v15 }
  0x33   :  { %vm68_vm11 = vmand %vm67_vm10, %vm66_vm9 }
  0x34   :  { %v70_v18 = vsel %vm68_vm11, %v69_v16, %v65_v15 }
  0x35   :  { %v71_v19 = vsel %vm58_vm8, 2, %v70_v18 }
  0x36   :  { %vm72_vm13 = vcmp.eq.s32.totalorder %v56_v17, %v71_v19 }
  0x37   :  { %vm74_vm14 = vmand %vm72_vm13, %vm73_vm12 }
  0x38   :  { %v96_v21 = vsel %vm74_vm14, 1.0, %v184_v20 }
  0x39   :  { %78 = vst [vmem:[#allocation7] sm:$0xff] %v96_v21 }
  0x3a   :  { %160 = shalt.err (!%p157_p6)
}
  0x3b   :  { %s161_s10 = scalar_lea.hbm %s246_s2, 128 }
  0x3c   :  { %p162_p7 = scmp.ne.s32.totalorder %s246_s2, %s161_s10  ;;  %p165_p8 = scmp.lt.u32.totalorder %s161_s10, %s246_s2 }
  0x3e   :  { %p167_p9 = pnand %p165_p8, %p162_p7 }
  0x40   :  { %170 = shalt.err (!%p167_p9)
}
  0x41   :  { %88 = dma.vmem_to_hbm [thread:$0]  %s86_s6, 128, %s246_s2, [#allocation4]  }
  0x42   :  { %175 = dma.done.wait [#allocation4], 128  }
  0x43   :  { %176 = vsyncadd [#allocation4], 4294967168 }
  0x44   :  { %92 = vsyncpa [#allocation3], 1 }
  0x45   :  { %93 = vsyncpa [#allocation6], 1 }
  0x46   :  { %94 = vsyncpa [#allocation4], 1 }

</bundles_post_ra>
